<compile_context>
chip_gen: v7x
topology: tpu7x:2x2x1
jax: 0.10.0
libtpu: 0.0.40
codegen_flags: <defaults>
</compile_context>

<pallas_src>
from collections import defaultdict
from functools import partial

import numpy as np
import jax
import jax.numpy as jnp
from jax.experimental import pallas as pl
from jax.experimental.pallas import tpu as pltpu


# --------------------------------- kernel ---------------------------------

def round_ste_kernel(x_ref, noise_ref, int_mask_ref, bin_mask_ref, o_ref, *,
                     has_int, has_bin):
    x = x_ref[...].astype(jnp.float32)            # (TB, Nf)
    out = x
    if has_int or has_bin:
        noise = noise_ref[...]                    # (TB, Nf)  Logistic(0,1) = g1 - g0
        x_flr = jnp.floor(x)

        int_m = int_mask_ref[...] > 0.5 if has_int else None   # (1, Nf) broadcast
        bin_m = bin_mask_ref[...] > 0.5 if has_bin else None   # (1, Nf) broadcast

        # Shared binarize argument: fractional part for int cols, raw x for bin.
        if has_int and has_bin:
            z = jnp.where(int_m, x - x_flr, x) - 0.5
        elif has_int:
            z = x - x_flr - 0.5
        else:
            z = x - 0.5

        # Hard Gumbel binarize:  sigmoid((z+g1-g0)/T) > 0.5  <=>  z + L > 0.
        bnr = (z + noise > 0.0).astype(jnp.float32)

        if has_int:
            out = jnp.where(int_m, x_flr + bnr, out)
        if has_bin:                               # bin assigned last (wins on overlap)
            out = jnp.where(bin_m, bnr, out)

    o_ref[...] = out.astype(o_ref.dtype)


# -------------------------------- wrapper ---------------------------------

def round_ste_pallas(x, int_ind, bin_ind, key, temperature=1.0,
                     target_block_bytes=1 << 20):
    """STE-round one [batch, n_vars] tensor with a Pallas kernel.

    `temperature` only shapes the (unimplemented) STE backward; the hard
    forward value is temperature-independent, so it is unused here.
    """
    del temperature
    B, N = x.shape
    orig_dtype = x.dtype
    int_ind = np.asarray(int_ind, dtype=np.int64).reshape(-1)
    bin_ind = np.asarray(bin_ind, dtype=np.int64).reshape(-1)
    has_int = int_ind.size > 0
    has_bin = bin_ind.size > 0
    if not (has_int or has_bin):
        return x                                  # nothing to round (pass-through)

    # Host-side column masks (static per (N, index-set) configuration).
    int_mask = np.zeros((N,), np.float32)
    bin_mask = np.zeros((N,), np.float32)
    if has_int:
        int_mask[int_ind] = 1.0
    if has_bin:
        bin_mask[bin_ind] = 1.0

    # Lane-dense layout: fold k consecutive rows into the lane dim so the
    # last dim is a multiple of 128 (N=16 -> k=8 -> 128 lanes, unmasked vst).
    k = 128 // N if (N < 128 and 128 % N == 0) else 1
    Nf = k * N

    # Row tile: ~target_block_bytes of f32 per block (large blocks amortize the
    # ~0.35us/step overhead and reach the HBM roofline), multiple of 8 sublanes,
    # capped at the (padded) folded batch.  ~1 MiB x 3 double-buffered arrays
    # stays well inside the default scoped VMEM on v5e/v6e/v7x.
    rows_budget = max(1, target_block_bytes // (Nf * 4))
    Bf = -(-B // k)                               # ceil(B / k)
    row_tile = min(max(8, (rows_budget // 8) * 8), -(-Bf // 8) * 8)
    Bf_pad = -(-Bf // row_tile) * row_tile
    B_pad = Bf_pad * k

    # One shared Logistic(0,1) draw per element ( = g1 - g0 of two Gumbels).
    noise = jax.random.logistic(key, (B, N), dtype=jnp.float32)

    if B_pad != B:
        pad = ((0, B_pad - B), (0, 0))
        x_in = jnp.pad(x, pad)
        noise = jnp.pad(noise, pad)
    else:
        x_in = x
    x_in = x_in.reshape(Bf_pad, Nf)               # native dtype, no wrapper f32 cast
    noise = noise.reshape(Bf_pad, Nf)
    int_mask_f = jnp.asarray(np.tile(int_mask, k).reshape(1, Nf))
    bin_mask_f = jnp.asarray(np.tile(bin_mask, k).reshape(1, Nf))

    out = pl.pallas_call(
        partial(round_ste_kernel, has_int=has_int, has_bin=has_bin),
        out_shape=jax.ShapeDtypeStruct((Bf_pad, Nf), orig_dtype),
        grid=(Bf_pad // row_tile,),
        in_specs=[
            pl.BlockSpec((row_tile, Nf), lambda i: (i, 0)),
            pl.BlockSpec((row_tile, Nf), lambda i: (i, 0)),
            pl.BlockSpec((1, Nf), lambda i: (0, 0)),
            pl.BlockSpec((1, Nf), lambda i: (0, 0)),
        ],
        out_specs=pl.BlockSpec((row_tile, Nf), lambda i: (i, 0)),
        compiler_params=pltpu.CompilerParams(
            # Pure element-wise, no cross-step state -> shard the batch grid
            # across TensorCores (free ~2x on v7x, no-op on v5e/v6e).
            dimension_semantics=("parallel",)),
    )(x_in, noise, int_mask_f, bin_mask_f)

    return out.reshape(B_pad, N)[:B]


class RoundSTEModelPallas:
    """JAX/Pallas port of roundSTEModel (forward pass only)."""

    def __init__(self, param_keys, var_keys, output_keys=(),
                 int_ind=None, bin_ind=None, tolerance=1e-3,
                 temperature=1.0, name="Rounding"):
        self.param_keys = list(param_keys)
        self.var_keys = list(var_keys)
        self.input_keys = self.param_keys + self.var_keys
        self.output_keys = list(output_keys) if output_keys else self.var_keys
        self.int_ind = int_ind if int_ind is not None else defaultdict(list)
        self.bin_ind = bin_ind if bin_ind is not None else defaultdict(list)
        self.tolerance = tolerance          # unused in forward (API parity)
        self.temperature = temperature      # forward hard value is T-independent
        self.name = name

    def __call__(self, data, key=None):
        if key is None:
            key = jax.random.PRNGKey(0)
        output_data = {}
        for j, (k_in, k_out) in enumerate(zip(self.var_keys, self.output_keys)):
            # fold_in gives each variable key an independent noise stream
            # (no seed collisions across keys/tiles).
            output_data[k_out] = round_ste_pallas(
                data[k_in], self.int_ind[k_in], self.bin_ind[k_in],
                jax.random.fold_in(key, j), self.temperature)
        return output_data


# ---------------------------------- main ----------------------------------

if __name__ == "__main__":
    key = jax.random.PRNGKey(0)
    k_p, k_x, k_noise = jax.random.split(key, 3)

    B, N_PARAM, N_VAR = 16, 4, 16
    data = {
        "p": jax.random.uniform(k_p, (B, N_PARAM), jnp.float32, -2.0, 2.0),
        "x": jax.random.uniform(k_x, (B, N_VAR), jnp.float32, -5.0, 5.0),
    }

    int_ind = defaultdict(list, {"x": [0, 1, 2, 3, 4, 5]})
    bin_ind = defaultdict(list, {"x": [6, 7, 8, 9]})

    model = RoundSTEModelPallas(
        param_keys=["p"], var_keys=["x"], output_keys=["x_rnd"],
        int_ind=int_ind, bin_ind=bin_ind, temperature=1.0)

    out = model(data, key=k_noise)
    x_rnd = jax.block_until_ready(out["x_rnd"])

    # --- sanity checks on forward semantics ---
    x_np = np.asarray(data["x"])
    y_np = np.asarray(x_rnd)
    assert y_np.shape == x_np.shape and y_np.dtype == x_np.dtype

    flr = np.floor(x_np[:, int_ind["x"]])
    int_out = y_np[:, int_ind["x"]]
    assert np.all(np.isclose(int_out, flr) | np.isclose(int_out, flr + 1.0)), \
        "int columns must round to floor or floor+1"

    bin_out = y_np[:, bin_ind["x"]]
    assert np.all((bin_out == 0.0) | (bin_out == 1.0)), "bin columns must be {0,1}"

    other = [c for c in range(N_VAR) if c not in int_ind["x"] + bin_ind["x"]]
    assert np.allclose(y_np[:, other], x_np[:, other]), "other columns unchanged"

    print("KERNEL_OK")
</pallas_src>

<mosaic_0001>
module attributes {stable_mosaic.version = 11 : i64} {
  func.func @round_ste_kernel(%arg0: i32, %arg1: memref<8x128xf32, #tpu.memory_space<vmem>>, %arg2: memref<8x128xf32, #tpu.memory_space<vmem>>, %arg3: memref<1x128xf32, #tpu.memory_space<vmem>>, %arg4: memref<1x128xf32, #tpu.memory_space<vmem>>, %arg5: memref<8x128xf32, #tpu.memory_space<vmem>>) attributes {dimension_semantics = [#tpu.dimension_semantics<parallel>], iteration_bounds = array<i64: 1>, scalar_prefetch = 0 : i64, scratch_operands = 0 : i64, tpu.core_type = #tpu.core_type<tc>, window_params = [{transform_indices = @transform_0, window_bounds = array<i64: 8, 128>}, {transform_indices = @transform_1, window_bounds = array<i64: 8, 128>}, {pipeline_mode = #tpu.pipeline_mode<synchronous>, transform_indices = @transform_2, window_bounds = array<i64: 1, 128>}, {pipeline_mode = #tpu.pipeline_mode<synchronous>, transform_indices = @transform_3, window_bounds = array<i64: 1, 128>}, {transform_indices = @transform_4, window_bounds = array<i64: 8, 128>}]} {
    %c0 = arith.constant 0 : index
    %c0_0 = arith.constant 0 : index
    %0 = vector.load %arg1[%c0, %c0_0] : memref<8x128xf32, #tpu.memory_space<vmem>>, vector<8x128xf32>
    %c0_1 = arith.constant 0 : index
    %c0_2 = arith.constant 0 : index
    %1 = vector.load %arg2[%c0_1, %c0_2] : memref<8x128xf32, #tpu.memory_space<vmem>>, vector<8x128xf32>
    %2 = math.floor %0 : vector<8x128xf32>
    %c0_3 = arith.constant 0 : index
    %c0_4 = arith.constant 0 : index
    %3 = vector.load %arg3[%c0_3, %c0_4] : memref<1x128xf32, #tpu.memory_space<vmem>>, vector<1x128xf32>
    %cst = arith.constant 5.000000e-01 : f32
    %4 = vector.broadcast %cst : f32 to vector<1x128xf32>
    %5 = arith.cmpf ogt, %3, %4 : vector<1x128xf32>
    %c0_5 = arith.constant 0 : index
    %c0_6 = arith.constant 0 : index
    %6 = vector.load %arg4[%c0_5, %c0_6] : memref<1x128xf32, #tpu.memory_space<vmem>>, vector<1x128xf32>
    %cst_7 = arith.constant 5.000000e-01 : f32
    %7 = vector.broadcast %cst_7 : f32 to vector<1x128xf32>
    %8 = arith.cmpf ogt, %6, %7 : vector<1x128xf32>
    %9 = arith.subf %0, %2 : vector<8x128xf32>
    %10 = vector.shape_cast %5 : vector<1x128xi1> to vector<1x128xi1>
    %11 = vector.broadcast %10 : vector<1x128xi1> to vector<8x128xi1>
    %12 = arith.select %11, %9, %0 : vector<8x128xi1>, vector<8x128xf32>
    %cst_8 = arith.constant 5.000000e-01 : f32
    %13 = vector.broadcast %cst_8 : f32 to vector<8x128xf32>
    %14 = arith.subf %12, %13 : vector<8x128xf32>
    %15 = arith.addf %14, %1 : vector<8x128xf32>
    %cst_9 = arith.constant 0.000000e+00 : f32
    %16 = vector.broadcast %cst_9 : f32 to vector<8x128xf32>
    %17 = arith.cmpf ogt, %15, %16 : vector<8x128xf32>
    %18 = arith.extui %17 : vector<8x128xi1> to vector<8x128xi32>
    %19 = arith.sitofp %18 : vector<8x128xi32> to vector<8x128xf32>
    %20 = arith.addf %2, %19 : vector<8x128xf32>
    %21 = vector.shape_cast %5 : vector<1x128xi1> to vector<1x128xi1>
    %22 = vector.broadcast %21 : vector<1x128xi1> to vector<8x128xi1>
    %23 = arith.select %22, %20, %0 : vector<8x128xi1>, vector<8x128xf32>
    %24 = vector.shape_cast %8 : vector<1x128xi1> to vector<1x128xi1>
    %25 = vector.broadcast %24 : vector<1x128xi1> to vector<8x128xi1>
    %26 = arith.select %25, %19, %23 : vector<8x128xi1>, vector<8x128xf32>
    %c0_10 = arith.constant 0 : index
    %c0_11 = arith.constant 0 : index
    %27 = vector.load %arg5[%c0_10, %c0_11] : memref<8x128xf32, #tpu.memory_space<vmem>>, vector<8x128xf32>
    tpu.vector_store %arg5[%c0_10, %c0_11], %26 {strides = array<i32>} : memref<8x128xf32, #tpu.memory_space<vmem>>, vector<8x128xf32>,
    return
  }
  func.func @transform_0(%arg0: i32) -> (i32, i32) {
    %c0_i32 = arith.constant 0 : i32
    %c0_i32_0 = arith.constant 0 : i32
    return %arg0, %c0_i32 : i32, i32
  }
  func.func @transform_1(%arg0: i32) -> (i32, i32) {
    %c0_i32 = arith.constant 0 : i32
    %c0_i32_0 = arith.constant 0 : i32
    return %arg0, %c0_i32 : i32, i32
  }
  func.func @transform_2(%arg0: i32) -> (i32, i32) {
    %c0_i32 = arith.constant 0 : i32
    %c0_i32_0 = arith.constant 0 : i32
    %c0_i32_1 = arith.constant 0 : i32
    return %c0_i32, %c0_i32_0 : i32, i32
  }
  func.func @transform_3(%arg0: i32) -> (i32, i32) {
    %c0_i32 = arith.constant 0 : i32
    %c0_i32_0 = arith.constant 0 : i32
    %c0_i32_1 = arith.constant 0 : i32
    return %c0_i32, %c0_i32_0 : i32, i32
  }
  func.func @transform_4(%arg0: i32) -> (i32, i32) {
    %c0_i32 = arith.constant 0 : i32
    %c0_i32_0 = arith.constant 0 : i32
    return %arg0, %c0_i32 : i32, i32
  }
}

</mosaic_0001>

<bundles_post_ra>
// kernel: tpu_custom_call.1
= control target key start
LH: loop header
LB: loop body
LE: loop exit
PB: predicated region body
PF: predicated region fallthrough
CT: control target
= control target key end

     0   :  { %9 = vsyncpa [#allocation3], 0  ;;  %s239_s0 = inlined_call_operand.hbm [shape: f32[8,128], index: 0, kind: input, shape index: {}]   ;;  %s240_s1 = inlined_call_operand.hbm [shape: f32[8,128], index: 1, kind: input, shape index: {}]   ;;  %s241_s2 = inlined_call_operand.vmem [shape: f32[1,128], index: 2, kind: input, shape index: {}]   ;;  %s242_s3 = inlined_call_operand.vmem [shape: f32[1,128], index: 3, kind: input, shape index: {}]   ;;  %s243_s4 = inlined_call_operand.hbm [shape: f32[8,128], index: 4, kind: output, shape index: {}]  }
   0x1   :  { %10 = vsyncpa [#allocation6], 0 }
   0x2   :  { %11 = vsyncpa [#allocation4], 0  ;;  %s167_s15 = smov [#allocation2]   ;;  %s168_s17 = smov [#allocation5]  }
   0x3   :  { %s18_s16 = sshll.u32 %s167_s15, 4  ;;  %s28_s18 = sshll.u32 %s168_s17, 4  ;;  %s19_s16 = int_to_ptr.vmem [resolvable:$true] %s18_s16  ;;  %s29_s18 = int_to_ptr.vmem [resolvable:$true] %s28_s18 }
   0x4   :  { %s95_s21 = scalar_lea.hbm %s239_s0, 128 }
   0x5   :  { %p96_p0 = scmp.ne.s32.totalorder %s239_s0, %s95_s21  ;;  %p99_p1 = scmp.lt.u32.totalorder %s95_s21, %s239_s0 }
   0x7   :  { %p101_p2 = pnand %p99_p1, %p96_p0 }
   0x9   :  { %104 = shalt.err (!%p101_p2)
}
   0xa   :  { %s105_s26 = scalar_lea.vmem %s19_s16, 128  ;;  %p110_p4 = scmp.lt.s32.totalorder %s19_s16, %s19_s16 }
   0xb   :  { %p106_p3 = scmp.ne.s32.totalorder %s19_s16, %s105_s26  ;;  %p111_p5 = scmp.lt.s32.totalorder %s105_s26, %s105_s26 }
   0xd   :  { %p112_p6 = por %p111_p5, %p110_p4 }
   0xf   :  { %p113_p7 = pnand %p112_p6, %p106_p3 }
  0x11   :  { %116 = shalt.err (!%p113_p7)
}
  0x12   :  { %21 = dma.hbm_to_vmem [thread:$0]  %s239_s0, 128, %s19_s16, [#allocation3]  }
  0x13   :  { %s117_s5 = scalar_lea.hbm %s240_s1, 128 }
  0x14   :  { %p118_p8 = scmp.ne.s32.totalorder %s240_s1, %s117_s5  ;;  %p121_p9 = scmp.lt.u32.totalorder %s117_s5, %s240_s1 }
  0x16   :  { %p123_p10 = pnand %p121_p9, %p118_p8 }
  0x18   :  { %126 = shalt.err (!%p123_p10)
}
  0x19   :  { %s127_s10 = scalar_lea.vmem %s29_s18, 128  ;;  %p132_p12 = scmp.lt.s32.totalorder %s29_s18, %s29_s18 }
  0x1a   :  { %p128_p11 = scmp.ne.s32.totalorder %s29_s18, %s127_s10  ;;  %p133_p13 = scmp.lt.s32.totalorder %s127_s10, %s127_s10 }
  0x1c   :  { %p134_p0 = por %p133_p13, %p132_p12 }
  0x1e   :  { %p135_p1 = pnand %p134_p0, %p128_p11 }
  0x20   :  { %138 = shalt.err (!%p135_p1)
}
  0x21   :  { %31 = dma.hbm_to_vmem [thread:$0]  %s240_s1, 128, %s29_s18, [#allocation6]  }
  0x22   :  { %161 = dma.done.wait [#allocation3], 128  }
  0x23   :  { %162 = vsyncadd [#allocation3], 4294967168 }
  0x24   :  { %163 = dma.done.wait [#allocation6], 128  }
  0x25   :  { %164 = vsyncadd [#allocation6], 4294967168  ;;  %v51_v0 = vlaneseq  ;;  %v42_v3 = vld [vmem:[#allocation2] sm:$0xff]  ;;  %v169_v7 = vmov 0   ;;  %v43_v11 = vld [vmem:[#allocation5] sm:$0xff]  ;;  %v170_v17 = vmov 0.0  }
  0x26   :  { %v45_v4 = vld [vmem:[%s241_s2] sm:$0x1]  ;;  %v44_v5 = vfloor.f32 %v42_v3  ;;  %s171_s1 = smov [#allocation7]  }
  0x27   :  { %v52_v1 = vshrl.u32 %v51_v0, 7  ;;  %vm46_vm0 = vcmp.gt.f32.partialorder %v45_v4, 0.5  ;;  %v47_v6 = vld [vmem:[%s242_s3] sm:$0x1]  ;;  %s78_s2 = sshll.u32 %s171_s1, 4  ;;  %s79_s2 = int_to_ptr.vmem [resolvable:$true] %s78_s2 }
  0x28   :  { %v50_v8 = vsel %vm46_vm0, 1, %v169_v7  ;;  %vm48_vm1 = vcmp.gt.f32.partialorder %v47_v6, 0.5  ;;  %v49_v9 = vsub.f32 %v42_v3, %v44_v5  ;;  %s139_s3 = scalar_lea.vmem %s79_s2, 128  ;;  %p144_p3 = scmp.lt.s32.totalorder %s79_s2, %s79_s2 }
  0x29   :  { %v53_v2 = vsub.s32 0, %v52_v1  ;;  %v64_v13 = vsel %vm48_vm1, 1, %v169_v7  ;;  %p140_p2 = scmp.ne.s32.totalorder %s79_s2, %s139_s3  ;;  %p145_p4 = scmp.lt.s32.totalorder %s139_s3, %s139_s3 }
  0x2b   :  { %v54_v10 = vrot.slane %v50_v8, %v53_v2  ;;  %v68_v16 = vrot.slane %v64_v13, %v53_v2  ;;  %p146_p5 = por %p145_p4, %p144_p3 }
  0x2d   :  { %vm55_vm2 = vcmp.eq.s32.totalorder %v54_v10, 1  ;;  %vm69_vm4 = vcmp.eq.s32.totalorder %v68_v16, 1  ;;  %p147_p6 = pnand %p146_p5, %p140_p2 }
  0x2e   :  { %v56_v12 = vsel %vm55_vm2, %v49_v9, %v42_v3 }
  0x2f   :  { %v88_v14 = vadd.f32 -0.5, %v56_v12 }
  0x31   :  { %v58_v15 = vadd.f32 %v88_v14, %v43_v11 }
  0x33   :  { %vm59_vm3 = vcmp.gt.f32.partialorder %v58_v15, 0.0 }
  0x34   :  { %v89_v18 = vsel %vm59_vm3, 1.0, %v170_v17 }
  0x35   :  { %v62_v19 = vadd.f32 %v89_v18, %v44_v5 }
  0x37   :  { %v63_v20 = vsel %vm55_vm2, %v62_v19, %v42_v3 }
  0x38   :  { %v70_v21 = vsel %vm69_vm4, %v89_v18, %v63_v20 }
  0x39   :  { %71 = vst [vmem:[#allocation7] sm:$0xff] %v70_v21 }
  0x3a   :  { %150 = shalt.err (!%p147_p6)
}
  0x3b   :  { %s151_s18 = scalar_lea.hbm %s243_s4, 128 }
  0x3c   :  { %p152_p7 = scmp.ne.s32.totalorder %s243_s4, %s151_s18  ;;  %p155_p8 = scmp.lt.u32.totalorder %s151_s18, %s243_s4 }
  0x3e   :  { %p157_p9 = pnand %p155_p8, %p152_p7 }
  0x40   :  { %160 = shalt.err (!%p157_p9)
}
  0x41   :  { %81 = dma.vmem_to_hbm [thread:$0]  %s79_s2, 128, %s243_s4, [#allocation4]  }
  0x42   :  { %165 = dma.done.wait [#allocation4], 128  }
  0x43   :  { %166 = vsyncadd [#allocation4], 4294967168 }
  0x44   :  { %85 = vsyncpa [#allocation3], 1 }
  0x45   :  { %86 = vsyncpa [#allocation6], 1 }
  0x46   :  { %87 = vsyncpa [#allocation4], 1 }

</bundles_post_ra>
